<compile_context>
chip_gen: v5e
topology: v5e:2x2
jax: 0.10.0
libtpu: 0.0.40
codegen_flags: <defaults>
</compile_context>

<pallas_src>
import functools
import math

import jax
import jax.numpy as jnp
from jax import lax
from jax.experimental import pallas as pl
from jax.experimental.pallas import tpu as pltpu


def _round_up(x, m):
    return ((x + m - 1) // m) * m


def _select(value, ranges, index, dim):
    """Plain-JAX glue, mirrors easymocap `select`."""
    if len(ranges) > 0:
        if ranges[1] == -1:
            return value[..., ranges[0]:]
        return value[..., ranges[0]:ranges[1]]
    if len(index) > 0:
        idx = list(index)
        if dim == -1:
            return value[..., idx]
        elif dim == -2:
            return value[..., idx, :]
        return value
    return value


def _reference(value, weights, order, norm, rho2):
    """Pure-JAX reference (also the dispatch path for tiny / 1-D inputs)."""
    value = value.astype(jnp.float32)
    loss = jnp.float32(0.0)
    for width, w in enumerate(weights, start=1):
        vel = value[width:] - value[:-width]
        if order == 2:
            vel = vel[1:] - vel[:-1]
        sq = jnp.sum(vel * vel, axis=-1)
        term = sq / (sq + jnp.float32(rho2)) if norm == 'gm' else sq
        loss = loss + jnp.float32(w) * (jnp.sum(term) / term.size)
    return loss


def _smooth_kernel(*refs, bt, halo_pad, widths, order2, coeffs, limits,
                   norm, rho2, approx_recip):
    """One independent row-block of the AnySmooth reduction (no carried state).

    refs: (x_ref, h_ref, [m_ref], out_ref, work_ref)
      x_ref:    (bt, Cp)       main block of the flattened value (rows = frames)
      h_ref:    (halo_pad, Cp) the rows immediately after the block (forward halo)
      m_ref:    (Cp, Jp)       0/1 block-diagonal group-sum matrix ('gm' only)
      out_ref:  (1, 8, 128)    per-block partial sum (broadcast scalar)
      work_ref: (bt+halo_pad, Cp) f32 VMEM work slab
    All keyword args are static Python values baked into the kernel.
    """
    if norm == 'gm':
        x_ref, h_ref, m_ref, out_ref, work_ref = refs
    else:
        x_ref, h_ref, out_ref, work_ref = refs

    i = pl.program_id(0)

    # One f32 slab per block: main rows + forward halo (written once, aligned).
    x32 = x_ref[...].astype(jnp.float32)
    work_ref[pl.ds(0, bt), :] = x32
    work_ref[pl.ds(bt, halo_pad), :] = h_ref[...].astype(jnp.float32)

    # Global base-row (frame) index handled by each local row of this block.
    r = i * bt + lax.broadcasted_iota(jnp.int32, (bt, 1), 0)          # (bt, 1)

    total = jnp.float32(0.0)
    for w, coeff, limit in zip(widths, coeffs, limits):               # static unroll
        if order2:
            vel = ((work_ref[pl.ds(w + 1, bt), :] - work_ref[pl.ds(1, bt), :])
                   - (work_ref[pl.ds(w, bt), :] - x32))               # 2nd-order diff
        else:
            vel = work_ref[pl.ds(w, bt), :] - x32
        sq = vel * vel                                                # VPU elementwise
        # Validity mask folded into a per-row coefficient (weight/numel or 0).
        mcoeff = jnp.where(r < limit, jnp.float32(coeff), jnp.float32(0.0))
        if norm == 'gm':
            # Per-joint sums over D via block-diagonal 0/1 matmul on the idle MXU.
            ssum = jnp.dot(sq, m_ref[...], preferred_element_type=jnp.float32)
            denom = ssum + jnp.float32(rho2)
            if approx_recip:
                term = ssum * pl.reciprocal(denom, approx=True)       # EUP slot
            else:
                term = ssum / denom
            total = total + jnp.sum(mcoeff * term)
        else:  # 'l2'
            rowsum = jnp.sum(sq, axis=-1, keepdims=True)              # XLU lane reduce
            total = total + jnp.sum(mcoeff * rowsum)

    out_ref[...] = jnp.full(out_ref.shape, total, dtype=jnp.float32)  # lane-dense vst


def _any_smooth_pallas(value, weights, order, norm, rho2, block_rows, approx_recip):
    T = value.shape[0]
    W = len(weights)
    G = math.prod(value.shape[1:-1]) if value.ndim > 2 else 1         # "joint" dims
    D = value.shape[-1]
    o2 = 1 if order == 2 else 0

    C = G * D
    Cp = _round_up(max(C, 1), 128)                 # lane-dense, zero lanes are free
    flat = value.reshape(T, C)
    if Cp != C:
        flat = jnp.pad(flat, ((0, 0), (0, Cp - C)))

    widths = tuple(range(1, W + 1))
    halo_pad = _round_up(max(W + o2, 1), 8)        # rows needed beyond the block

    limits, coeffs = [], []
    for w, wt in zip(widths, weights):
        L = max(T - w - o2, 0)                     # frames in vel_w
        numel = L * G                              # torch: square_diff.numel()
        limits.append(L)
        # NOTE: PyTorch divides by zero (NaN) when numel == 0; we emit 0 instead.
        coeffs.append(float(wt) / numel if numel > 0 else 0.0)

    itemsize = jnp.dtype(value.dtype).itemsize
    try:
        vmem_cap = int(pltpu.get_tpu_info().vmem_capacity_bytes)
    except Exception:
        vmem_cap = 64 * 1024 * 1024                # conservative (v7x-sized) fallback
    if block_rows is None:
        # ~1/5 of physical VMEM for (double-buffered input + f32 work slab).
        budget = max(4 << 20, min(20 << 20, vmem_cap // 5))
        per_row = Cp * (2 * itemsize + 4)
        bt = (budget // max(per_row, 1)) // halo_pad * halo_pad
    else:
        bt = _round_up(block_rows, halo_pad)
    bt = min(max(bt, halo_pad), _round_up(T, halo_pad))

    nb = -(-T // bt)                               # ceil: blocks of base rows
    rows_total = nb * bt + halo_pad                # + halo for the last block
    flat = jnp.pad(flat, ((0, rows_total - T), (0, 0)))   # zero rows are masked out

    steps = bt // halo_pad                         # halo-block indices per main block
    in_specs = [
        pl.BlockSpec((bt, Cp), lambda i: (i, 0)),                       # main rows
        pl.BlockSpec((halo_pad, Cp), lambda i: ((i + 1) * steps, 0)),   # forward halo
    ]
    args = [flat, flat]

    Jp = 0
    if norm == 'gm':
        Jp = _round_up(max(G, 1), 128)
        lane = lax.broadcasted_iota(jnp.int32, (Cp, Jp), 0)
        col = lax.broadcasted_iota(jnp.int32, (Cp, Jp), 1)
        group_sum = jnp.where((lane // D == col) & (lane < C), 1.0, 0.0
                              ).astype(jnp.float32)
        in_specs.append(pl.BlockSpec((Cp, Jp), lambda i: (0, 0)))       # constant
        args.append(group_sum)

    kernel = functools.partial(
        _smooth_kernel, bt=bt, halo_pad=halo_pad, widths=widths, order2=bool(o2),
        coeffs=tuple(coeffs), limits=tuple(limits), norm=norm,
        rho2=float(rho2), approx_recip=approx_recip)

    vmem_need = (2 * bt * Cp * itemsize + 2 * halo_pad * Cp * itemsize
                 + (bt + halo_pad) * Cp * 4
                 + (2 * Cp * Jp * 4 if norm == 'gm' else 0) + (1 << 20))
    vmem_limit = int(max(32 << 20, min(vmem_need + (4 << 20), 56 << 20)))

    partials = pl.pallas_call(
        kernel,
        out_shape=jax.ShapeDtypeStruct((nb, 8, 128), jnp.float32),
        grid_spec=pltpu.PrefetchScalarGridSpec(
            num_scalar_prefetch=0,
            grid=(nb,),
            in_specs=in_specs,
            out_specs=pl.BlockSpec((1, 8, 128), lambda i: (i, 0, 0)),
            scratch_shapes=[pltpu.VMEM((bt + halo_pad, Cp), jnp.float32)]),
        compiler_params=pltpu.CompilerParams(
            dimension_semantics=("parallel",),     # no carried state: megacore OK
            vmem_limit_bytes=vmem_limit),
    )(*args)
    return jnp.sum(partials[:, 0, 0])              # tiny final reduce in XLA


class AnySmoothPallas:
    """JAX/Pallas port of easymocap AnySmooth (forward only)."""

    def __init__(self, key, weight, norm='l2', norm_info=1.0, ranges=(), index=(),
                 dim=-1, order=1, block_rows=None, use_pallas='auto',
                 approx_recip=True):
        assert norm in ('l2', 'gm')
        assert order in (1, 2)
        self.key = key
        self.weight = tuple(float(w) for w in weight)
        self.norm = norm
        self.rho2 = float(norm_info) * float(norm_info) if norm == 'gm' else 0.0
        self.ranges = tuple(ranges)
        self.index = tuple(index)
        self.dim = dim
        self.order = order
        self.block_rows = block_rows          # override block size (testing / tuning)
        self.use_pallas = use_pallas          # True | False | 'auto'
        self.approx_recip = approx_recip

    def __call__(self, **kwargs):
        value = kwargs[self.key]
        value = _select(value, self.ranges, self.index, self.dim)
        if value.shape[0] <= len(self.weight):
            # Matches PyTorch exactly: early exit returns a (1,)-shaped zero,
            # the main path returns a 0-d scalar.
            return jnp.zeros((1,), dtype=jnp.float32)

        dispatch = self.use_pallas
        if dispatch == 'auto':
            # Tiny inputs: pallas launch + DMA setup dominates -> let XLA fuse it.
            nbytes = value.size * jnp.dtype(value.dtype).itemsize
            dispatch = value.ndim >= 2 and nbytes >= (64 << 10)
        if not dispatch or value.ndim < 2 or len(self.weight) == 0:
            return _reference(value, self.weight, self.order, self.norm, self.rho2)

        return _any_smooth_pallas(value, self.weight, self.order, self.norm,
                                  self.rho2, self.block_rows, self.approx_recip)


if __name__ == "__main__":
    key = jax.random.PRNGKey(0)
    # value: (T=64 frames, J=4 joints, D=32 feature dims)
    T, J, D = 64, 4, 32
    value = jax.random.normal(key, (T, J, D), dtype=jnp.float32)

    # l2, order 1 — small forced block so the multi-block halo/mask path runs.
    smooth = AnySmoothPallas(key='poses', weight=[0.5, 0.3, 0.1], norm='l2',
                             order=1, block_rows=16, use_pallas=True)
    loss = jax.block_until_ready(smooth(poses=value))
    ref = _reference(value, smooth.weight, smooth.order, smooth.norm, smooth.rho2)
    assert jnp.allclose(loss, ref, rtol=1e-4, atol=1e-4), (loss, ref)

    # l2 with automatic block sizing (single-block path).
    smooth_b = AnySmoothPallas(key='poses', weight=[1.0], norm='l2', order=1,
                               use_pallas=True)
    loss_b = jax.block_until_ready(smooth_b(poses=value))
    ref_b = _reference(value, smooth_b.weight, 1, 'l2', 0.0)
    assert jnp.allclose(loss_b, ref_b, rtol=1e-4, atol=1e-4), (loss_b, ref_b)

    # gm (GMoF), order 2 — lane-dense layout + MXU group-sum, EUP reciprocal.
    smooth_gm = AnySmoothPallas(key='poses', weight=[1.0, 0.5], norm='gm',
                                norm_info=2.0, order=2, block_rows=32,
                                use_pallas=True)
    loss_gm = jax.block_until_ready(smooth_gm(poses=value))
    ref_gm = _reference(value, smooth_gm.weight, 2, 'gm', smooth_gm.rho2)
    assert jnp.allclose(loss_gm, ref_gm, rtol=2e-3, atol=2e-3), (loss_gm, ref_gm)

    # Early-exit path (T <= len(weight)) matches PyTorch's FloatTensor([0.0]).
    z = AnySmoothPallas(key='poses', weight=[1.0, 1.0, 1.0], norm='l2')(poses=value[:2])
    assert z.shape == (1,) and float(z[0]) == 0.0, z

    print("KERNEL_OK")
</pallas_src>

<mosaic_0001>
module attributes {stable_mosaic.version = 11 : i64} {
  func.func @_smooth_kernel(%arg0: i32, %arg1: memref<16x128xf32, #tpu.memory_space<vmem>>, %arg2: memref<8x128xf32, #tpu.memory_space<vmem>>, %arg3: memref<1x8x128xf32, #tpu.memory_space<vmem>>, %arg4: memref<24x128xf32, #tpu.memory_space<vmem>>) attributes {dimension_semantics = [#tpu.dimension_semantics<parallel>], iteration_bounds = array<i64: 4>, scalar_prefetch = 0 : i64, scratch_operands = 1 : i64, tpu.core_type = #tpu.core_type<tc>, window_params = [{transform_indices = @transform_0, window_bounds = array<i64: 16, 128>}, {transform_indices = @transform_1, window_bounds = array<i64: 8, 128>}, {transform_indices = @transform_2, window_bounds = array<i64: 1, 8, 128>}]} {
    %c0 = arith.constant 0 : index
    %c0_0 = arith.constant 0 : index
    %0 = vector.load %arg1[%c0, %c0_0] : memref<16x128xf32, #tpu.memory_space<vmem>>, vector<16x128xf32>
    %c0_1 = arith.constant 0 : index
    %c0_2 = arith.constant 0 : index
    %1 = vector.load %arg4[%c0_1, %c0_2] : memref<24x128xf32, #tpu.memory_space<vmem>>, vector<16x128xf32>
    tpu.vector_store %arg4[%c0_1, %c0_2], %0 {strides = array<i32>} : memref<24x128xf32, #tpu.memory_space<vmem>>, vector<16x128xf32>,
    %c0_3 = arith.constant 0 : index
    %c0_4 = arith.constant 0 : index
    %2 = vector.load %arg2[%c0_3, %c0_4] : memref<8x128xf32, #tpu.memory_space<vmem>>, vector<8x128xf32>
    %c16 = arith.constant 16 : index
    %c0_5 = arith.constant 0 : index
    %3 = vector.load %arg4[%c16, %c0_5] : memref<24x128xf32, #tpu.memory_space<vmem>>, vector<8x128xf32>
    tpu.vector_store %arg4[%c16, %c0_5], %2 {strides = array<i32>} : memref<24x128xf32, #tpu.memory_space<vmem>>, vector<8x128xf32>,
    %c16_i32 = arith.constant 16 : i32
    %4 = arith.muli %arg0, %c16_i32 : i32
    %5 = tpu.iota {dimensions = array<i32: 0>} : vector<16x1xi32>
    %6 = vector.broadcast %4 : i32 to vector<16x1xi32>
    %7 = arith.addi %6, %5 : vector<16x1xi32>
    %c1 = arith.constant 1 : index
    %c0_6 = arith.constant 0 : index
    %8 = vector.load %arg4[%c1, %c0_6] : memref<24x128xf32, #tpu.memory_space<vmem>>, vector<16x128xf32>
    %9 = arith.subf %8, %0 : vector<16x128xf32>
    %10 = arith.mulf %9, %9 : vector<16x128xf32>
    %c63_i32 = arith.constant 63 : i32
    %11 = vector.broadcast %c63_i32 : i32 to vector<16x1xi32>
    %12 = arith.cmpi slt, %7, %11 : vector<16x1xi32>
    %cst = arith.constant 0.0019841271 : f32
    %cst_7 = arith.constant 0.000000e+00 : f32
    %13 = vector.broadcast %cst : f32 to vector<16x1xf32>
    %14 = vector.broadcast %cst_7 : f32 to vector<16x1xf32>
    %15 = arith.select %12, %13, %14 : vector<16x1xi1>, vector<16x1xf32>
    %cst_8 = arith.constant dense<0.000000e+00> : vector<16xf32>
    %16 = vector.multi_reduction <add>, %10, %cst_8 [1] : vector<16x128xf32> to vector<16xf32>
    %17 = vector.shape_cast %16 : vector<16xf32> to vector<16x1xf32>
    %18 = arith.mulf %15, %17 : vector<16x1xf32>
    %19 = vector.shape_cast %18 : vector<16x1xf32> to vector<1x16x1xf32>
    %cst_9 = arith.constant dense<0.000000e+00> : vector<1xf32>
    %20 = vector.multi_reduction <add>, %19, %cst_9 [1, 2] : vector<1x16x1xf32> to vector<1xf32>
    %21 = vector.shape_cast %20 : vector<1xf32> to vector<1x1x1xf32>
    %22 = vector.extract %21[0, 0, 0] : f32 from vector<1x1x1xf32>
    %cst_10 = arith.constant 0.000000e+00 : f32
    %23 = arith.addf %cst_10, %22 : f32
    %c2 = arith.constant 2 : index
    %c0_11 = arith.constant 0 : index
    %24 = vector.load %arg4[%c2, %c0_11] : memref<24x128xf32, #tpu.memory_space<vmem>>, vector<16x128xf32>
    %25 = arith.subf %24, %0 : vector<16x128xf32>
    %26 = arith.mulf %25, %25 : vector<16x128xf32>
    %c62_i32 = arith.constant 62 : i32
    %27 = vector.broadcast %c62_i32 : i32 to vector<16x1xi32>
    %28 = arith.cmpi slt, %7, %27 : vector<16x1xi32>
    %cst_12 = arith.constant 0.00120967743 : f32
    %cst_13 = arith.constant 0.000000e+00 : f32
    %29 = vector.broadcast %cst_12 : f32 to vector<16x1xf32>
    %30 = vector.broadcast %cst_13 : f32 to vector<16x1xf32>
    %31 = arith.select %28, %29, %30 : vector<16x1xi1>, vector<16x1xf32>
    %cst_14 = arith.constant dense<0.000000e+00> : vector<16xf32>
    %32 = vector.multi_reduction <add>, %26, %cst_14 [1] : vector<16x128xf32> to vector<16xf32>
    %33 = vector.shape_cast %32 : vector<16xf32> to vector<16x1xf32>
    %34 = arith.mulf %31, %33 : vector<16x1xf32>
    %35 = vector.shape_cast %34 : vector<16x1xf32> to vector<1x16x1xf32>
    %cst_15 = arith.constant dense<0.000000e+00> : vector<1xf32>
    %36 = vector.multi_reduction <add>, %35, %cst_15 [1, 2] : vector<1x16x1xf32> to vector<1xf32>
    %37 = vector.shape_cast %36 : vector<1xf32> to vector<1x1x1xf32>
    %38 = vector.extract %37[0, 0, 0] : f32 from vector<1x1x1xf32>
    %39 = arith.addf %23, %38 : f32
    %c3 = arith.constant 3 : index
    %c0_16 = arith.constant 0 : index
    %40 = vector.load %arg4[%c3, %c0_16] : memref<24x128xf32, #tpu.memory_space<vmem>>, vector<16x128xf32>
    %41 = arith.subf %40, %0 : vector<16x128xf32>
    %42 = arith.mulf %41, %41 : vector<16x128xf32>
    %c61_i32 = arith.constant 61 : i32
    %43 = vector.broadcast %c61_i32 : i32 to vector<16x1xi32>
    %44 = arith.cmpi slt, %7, %43 : vector<16x1xi32>
    %cst_17 = arith.constant 4.09836066E-4 : f32
    %cst_18 = arith.constant 0.000000e+00 : f32
    %45 = vector.broadcast %cst_17 : f32 to vector<16x1xf32>
    %46 = vector.broadcast %cst_18 : f32 to vector<16x1xf32>
    %47 = arith.select %44, %45, %46 : vector<16x1xi1>, vector<16x1xf32>
    %cst_19 = arith.constant dense<0.000000e+00> : vector<16xf32>
    %48 = vector.multi_reduction <add>, %42, %cst_19 [1] : vector<16x128xf32> to vector<16xf32>
    %49 = vector.shape_cast %48 : vector<16xf32> to vector<16x1xf32>
    %50 = arith.mulf %47, %49 : vector<16x1xf32>
    %51 = vector.shape_cast %50 : vector<16x1xf32> to vector<1x16x1xf32>
    %cst_20 = arith.constant dense<0.000000e+00> : vector<1xf32>
    %52 = vector.multi_reduction <add>, %51, %cst_20 [1, 2] : vector<1x16x1xf32> to vector<1xf32>
    %53 = vector.shape_cast %52 : vector<1xf32> to vector<1x1x1xf32>
    %54 = vector.extract %53[0, 0, 0] : f32 from vector<1x1x1xf32>
    %55 = arith.addf %39, %54 : f32
    %56 = vector.broadcast %55 : f32 to vector<1x8x128xf32>
    %c0_21 = arith.constant 0 : index
    %c0_22 = arith.constant 0 : index
    %c0_23 = arith.constant 0 : index
    %57 = vector.load %arg3[%c0_21, %c0_22, %c0_23] : memref<1x8x128xf32, #tpu.memory_space<vmem>>, vector<1x8x128xf32>
    tpu.vector_store %arg3[%c0_21, %c0_22, %c0_23], %56 {strides = array<i32>} : memref<1x8x128xf32, #tpu.memory_space<vmem>>, vector<1x8x128xf32>,
    return
  }
  func.func @transform_0(%arg0: i32) -> (i32, i32) {
    %c0_i32 = arith.constant 0 : i32
    %c0_i32_0 = arith.constant 0 : i32
    return %arg0, %c0_i32 : i32, i32
  }
  func.func @transform_1(%arg0: i32) -> (i32, i32) {
    %c1_i32 = arith.constant 1 : i32
    %0 = arith.addi %arg0, %c1_i32 : i32
    %c2_i32 = arith.constant 2 : i32
    %1 = arith.muli %0, %c2_i32 : i32
    %c0_i32 = arith.constant 0 : i32
    %c0_i32_0 = arith.constant 0 : i32
    return %1, %c0_i32 : i32, i32
  }
  func.func @transform_2(%arg0: i32) -> (i32, i32, i32) {
    %c0_i32 = arith.constant 0 : i32
    %c0_i32_0 = arith.constant 0 : i32
    %c0_i32_1 = arith.constant 0 : i32
    return %arg0, %c0_i32, %c0_i32_0 : i32, i32, i32
  }
}

</mosaic_0001>

<bundles_post_ra>
// kernel: tpu_custom_call.1
= control target key start
LH: loop header
LB: loop body
LE: loop exit
PB: predicated region body
PF: predicated region fallthrough
CT: control target
= control target key end

     0   :  { %s949_s0 = inlined_call_operand.hbm [shape: f32[72,128], index: 0, kind: input, shape index: {}]   ;;  %s950_s1 = inlined_call_operand.hbm [shape: f32[72,128], index: 1, kind: input, shape index: {}]   ;;  %s951_s2 = inlined_call_operand.hbm [shape: f32[4,8,128], index: 2, kind: output, shape index: {}]  }
   0x1   :  { %957 = sst [smem:[#allocation16_spill]] %s949_s0 }
   0x2   :  { %7 = vsyncpa [#allocation4], 0 }
   0x3   :  { %9 = vsyncpa [#allocation4 + $0x1], 0 }
   0x4   :  { %10 = vsyncpa [#allocation7], 0 }
   0x5   :  { %12 = vsyncpa [#allocation7 + $0x1], 0 }
   0x6   :  { %13 = vsyncpa [#allocation5], 0 }
   0x7   :  { %15 = vsyncpa [#allocation5 + $0x1], 0  ;;  %s723_s9 = smov 0   ;;  %s725_s10 = smov 0  }
   0x8   :  { %s727_s11 = smov 0   ;;  %s729_s12 = smov 0  }
   0x9   :  { %s731_s13 = smov 0   ;;  %s733_s14 = smov 0  }
   0xa   :  { %s735_s15 = smov 0  }
   0xb LB: > { %958 = sst [smem:[#allocation12_spill]] %s698_s14  ;;  %s757_s16 = sadd.s32 4294967295, %s702_s15   ;;  %s702_s15 = sphi %s735_s15, %s973_s15   ;;  %s698_s14 = sphi %s733_s14, %s976_s14   ;;  %s694_s13 = sphi %s731_s13, %s981_s13   ;;  %s690_s12 = sphi %s729_s12, %s980_s12   ;;  %s686_s11 = sphi %s727_s11, %s979_s11   ;;  %s682_s10 = sphi %s725_s10, %s978_s10   ;;  %s678_s9 = sphi %s723_s9, %s977_s9  }
   0xc   : > { %s436_s17 = sadd.s32 4294967294, %s702_s15   ;;  %s761_s18 = sadd.s32 1, %s702_s15  }
   0xd   : > { %959 = sst [smem:[#allocation13_spill]] %s761_s18  ;;  %s28_s19 = sadd.s32 1, %s698_s14 }
   0xe   : > { %s25_s20 = ssub.s32 %s702_s15, %s761_s18  ;;  %p35_p0 = scmp.ne.s32.totalorder %s698_s14, %s694_s13 }
   0xf   : > { %p26_p1 = scmp.eq.s32.totalorder %s25_s20, 0  ;;  %p36_p2 = scmp.eq.s32.totalorder %s702_s15, 0 }
  0x10   : > { %p41_p3 = scmp.ne.s32.totalorder %s694_s13, %s690_s12  ;;  %p42_p4 = scmp.eq.s32.totalorder %s757_s16, 0 }
  0x11   : > { %s773_s21 = scalar_select %p26_p1, %s698_s14, %s28_s19  }
  0x12   : > { %p780_p5 = por %p36_p2, %p35_p0  ;;  %p789_p6 = por %p42_p4, %p41_p3 }
  0x13   : > { %960 = sst [smem:[#allocation14_spill]] %s773_s21  ;;  %s459_s24 = sshll.u32 %s702_s15, 1 }
  0x14   : > { %s58_s25 = sadd.s32 1, %s686_s11  ;;  %s460_s26 = sadd.s32 2, %s459_s24 }
  0x15   : > { %p65_p7 = scmp.ne.s32.totalorder %s686_s11, %s682_s10  ;;  %s462_s27 = sadd.s32 2, %s460_s26 }
  0x16   : > { %p71_p8 = scmp.ne.s32.totalorder %s682_s10, %s678_s9  ;;  %s55_s28 = ssub.s32 %s460_s26, %s462_s27 }
  0x17   : > { %p800_p9 = por %p65_p7, %p36_p2  ;;  %p56_p10 = scmp.eq.s32.totalorder %s55_s28, 0 }
  0x18   : > { %p806_p11 = por %p71_p8, %p42_p4  ;;  %p95_p12 = scmp.eq.s32.totalorder %s757_s16, 3 }
  0x19   : > { %p101_p13 = scmp.eq.s32.totalorder %s436_s17, 3  ;;  %p440_p7 = scmp.ge.s32.totalorder %s702_s15, 4 }
  0x1a   : > { %s812_s3 = scalar_select %p56_p10, %s686_s11, %s58_s25  }
  0x1b   : > { %p817_p1 = por %p95_p12, %p35_p0  ;;  %p824_p2 = por %p101_p13, %p41_p3 }
  0x1c   : > { %965 = sst [smem:[#allocation15_spill]] %s812_s3  ;;  %117 = sbr.rel (%p440_p7) target bundleno = 92 (0x5c), region = 16 }
  0x1d   : > { %s966_s4 = scalar_select %p817_p1, 1, 0 }
  0x1e   : > { %s967_s5 = scalar_select %p824_p2, 1, 0 }
  0x21   : > { %120 = sbr.rel (!%p780_p5) target bundleno = 76 (0x4c), region = 20  ;;  %s121_s6 = sand.u32 (%p780_p5), 1, %s698_s14  }
  0x22   : > { %s127_s7 = ssub.s32 (%p780_p5), 9, %s459_s24  ;;  %s441_s8 = sshll.u32 (%p780_p5), %s121_s6, 4 }
  0x23   : > { %p128_p4 = scmp.lt.s32.totalorder (%p780_p5), %s127_s7, 2  ;;  %s835_s20 = scalar_lea.sflag (%p780_p5), [#allocation4], %s121_s6 }
  0x24   : > { %s125_s25 = scalar_lea.vmem (%p780_p5), [#allocation3], %s441_s8 }
  0x26   : > { %s983_s7 = smov (!%p128_p4, %s127_s7), 2 }
  0x27   : > { %s443_s9 = sshll.u32 %s983_s7, 3 }
  0x28   : > { %s131_s17 = ssub.s32 16, %s443_s9 }
  0x29   : > { %s132_s19 = sshll.u32 %s131_s17, 4 }
  0x2a   : > { %133 = vsyncadd %s835_s20, %s132_s19  ;;  %p838_p0 = scmp.ne.s32.totalorder %s443_s9, 0  ;;  %s463_s24 = sshll.u32 %s702_s15, 4 }
  0x2b   : > { %s969_s0 = sld [smem:[#allocation16_spill]]  ;;  %s846_s21 = sshll.u32 %s125_s25, 4  ;;  %s141_s21 = int_to_ptr.vmem [resolvable:$true] %s846_s21 }
  0x2c   : > { %s952_s8 = sshll.u32 %s983_s7, 7 }
  0x2d   : > { %s543_s9 = sshrl.u32 %s952_s8, 4 }
  0x31   : > { %s136_s28 = scalar_lea.hbm %s969_s0, %s463_s24  ;;  %s552_s25 = scalar_lea.hbm %s969_s0, 72 }
  0x32   : > { %s138_s6 = sshll.u32 %s136_s28, 4  ;;  %s849_s6 = int_to_ptr.hbm [resolvable:$true] %s138_s6 }
  0x33   : > { %s541_s17 = sshra.s32 %s849_s6, 4  ;;  %s542_s17 = int_to_ptr.hbm [resolvable:$true] %s541_s17 }
  0x34   : > { %s548_s19 = scalar_lea.hbm %s542_s17, %s543_s9  ;;  %p553_p10 = scmp.lt.s32.totalorder %s542_s17, %s969_s0 }
  0x35   : > { %p549_p3 = scmp.ne.s32.totalorder %s542_s17, %s548_s19  ;;  %p554_p12 = scmp.lt.s32.totalorder %s552_s25, %s548_s19 }
  0x37   : > { %p550_p5 = pnand %p549_p3, %p838_p0  ;;  %p555_p13 = por %p554_p12, %p553_p10 }
  0x39   : > { %p551_p8 = pneg %p550_p5 }
  0x3b   : > { %p556_p7 = pnand %p555_p13, %p551_p8 }
  0x3d   : > { %559 = shalt.err (!%p556_p7)
}
  0x3e   : > { %s560_s8 = sshra.s32 %s141_s21, 4  ;;  %s704_s26 = smov [#allocation3]   ;;  %s561_s8 = int_to_ptr.vmem [resolvable:$true] %s560_s8 }
  0x3f   : > { %s567_s14 = scalar_lea.vmem %s561_s8, %s543_s9  ;;  %s571_s24 = scalar_lea.vmem %s704_s26, 32 }
  0x40   : > { %p568_p4 = scmp.ne.s32.totalorder %s561_s8, %s567_s14  ;;  %p573_p2 = scmp.lt.s32.totalorder %s571_s24, %s567_s14 }
  0x42   : > { %p569_p3 = pnand %p568_p4, %p838_p0 }
  0x44   : > { %p570_p5 = pneg %p569_p3 }
  0x46   : > { %p575_p1 = pnand %p573_p2, %p570_p5 }
  0x48   : > { %578 = shalt.err (!%p575_p1)
}
  0x49   : > { %s705_s17 = smov 128   ;;  %s706_s19 = smov 8  }
  0x4a   : > { %s970_s25 = sshll.u32 %s983_s7, 7 }
  0x4b   : > { %146 = dma.hbm_to_vmem [thread:$0]  (%p838_p0), %s849_s6, %s970_s25, %s141_s21, %s835_s20, %s705_s17, %s705_s17, %s706_s19  }
  0x4c PF: > { %s150_s8 = sand.u32 1, %s686_s11   ;;  %s449_s9 = sshll.u32 %s702_s15, 4 }
  0x4d   : > { %s448_s14 = sshll.u32 %s150_s8, 3  ;;  %s378_s26 = scalar_lea.hbm %s950_s1, %s449_s9 }
  0x4e   : > { %s379_s24 = scalar_lea.hbm %s378_s26, 16  ;;  %s154_s0 = scalar_lea.vmem [#allocation6], %s448_s14 }
  0x4f   : > { %s164_s3 = sshll.u32 %s154_s0, 4  ;;  %s162_s18 = sshll.u32 %s379_s24, 4  ;;  %s165_s3 = int_to_ptr.vmem [resolvable:$true] %s164_s3  ;;  %s163_s18 = int_to_ptr.hbm [resolvable:$true] %s162_s18 }
  0x50   : > { %s151_s22 = scalar_lea.sflag [#allocation7], %s150_s8  ;;  %s580_s7 = sshra.s32 %s163_s18, 4  ;;  %s581_s7 = int_to_ptr.hbm [resolvable:$true] %s580_s7 }
  0x51   : > { %s582_s21 = scalar_lea.hbm %s581_s7, 8  ;;  %s586_s17 = scalar_lea.hbm %s950_s1, 72 }
  0x52   : > { %p583_p1 = scmp.ne.s32.totalorder %s581_s7, %s582_s21  ;;  %p587_p8 = scmp.lt.s32.totalorder %s581_s7, %s950_s1 }
  0x53   : > { %p588_p10 = scmp.lt.s32.totalorder %s586_s17, %s582_s21 }
  0x54   : > { %p584_p2 = pnand %p583_p1, %p800_p9 }
  0x55   : > { %p589_p12 = por %p588_p10, %p587_p8 }
  0x56   : > { %p585_p0 = pneg %p584_p2 }
  0x58   : > { %p590_p13 = pnand %p589_p12, %p585_p0 }
  0x5a   : > { %593 = shalt.err (!%p590_p13)
}
  0x5b   : > { %472 = dma.hbm_to_vmem [thread:$0]  (%p800_p9), %s163_s18, 128, %s165_s3, %s151_s22  }
  0x5c PF: > { %p450_p7 = scmp.ge.s32.totalorder %s702_s15, 1  ;;  %p169_p4 = scmp.lt.s32.totalorder %s702_s15, 5 }
  0x5e   : > { %p170_p3 = pnand %p450_p7, %p169_p4 }
  0x5f   : > { %s893_s0 = sand.u32 (!%p170_p3), 1, %s694_s13  }
  0x60   : > { %173 = sbr.rel (%p170_p3) target bundleno = 438 (0x1b6), region = 28  ;;  %s451_s8 = sshll.u32 (!%p170_p3), %s893_s0, 4 }
  0x61   : > { %s176_s9 = scalar_lea.sflag (!%p170_p3), [#allocation4], %s893_s0  ;;  %s179_s14 = scalar_lea.vmem (!%p170_p3), [#allocation3], %s451_s8 }
  0x65   : > { %665 = dma.done.wait (%p789_p6), %s176_s9, 256  }
  0x66   : > { %667 = vsyncadd (%p789_p6), %s176_s9, 4294967040  ;;  %s185_s18 = sand.u32 1, %s682_s10  }
  0x67   : > { %s452_s29 = sshll.u32 %s185_s18, 3  ;;  %s186_s3 = scalar_lea.sflag [#allocation7], %s185_s18 }
  0x68   : > { %s189_s27 = scalar_lea.vmem [#allocation6], %s452_s29 }
  0x69   : > { %669 = dma.done.wait (%p806_p11), %s186_s3, 128  }
  0x6a   : > { %671 = vsyncadd (%p806_p11), %s186_s3, 4294967168  ;;  %v223_v0 = vld [vmem:[%s179_s14] sm:$0xff]  ;;  %v224_v1 = vld [vmem:[%s179_s14 + $0x8] sm:$0xff]  ;;  %v230_v21 = vlaneseq  ;;  %s454_s23 = sshll.u32 %s757_s16, 4  ;;  %v707_v30 = vmov 0.0   ;;  %vm252_vm6 = vcmask 7168  }
  0x6b   : > { %v227_v2 = vld [vmem:[%s189_s27] sm:$0xff]  ;;  %225 = vst [vmem:[#allocation2] sm:$0xff] %v223_v0  ;;  %v233_v23 = vstv %s454_s23  ;;  %s453_s30 = sshll.u32 %s893_s0, 3  ;;  %s456_s28 = sshll.u32 %s757_s16, 3 }
  0x6c   : > { %226 = vst [vmem:[#allocation2 + $0x8] sm:$0xff] %v224_v1  ;;  %v231_v22 = vshrl.u32 %v230_v21, 7  ;;  %s337_s22 = scalar_lea.hbm %s951_s2, %s456_s28  ;;  %s215_s20 = scalar_lea.vmem [#allocation8], %s453_s30 }
  0x6d   : > { %228 = vst [vmem:[#allocation2 + $0x10] sm:$0xff] %v227_v2  ;;  %s339_s6 = sshll.u32 %s215_s20, 4  ;;  %s341_s19 = sshll.u32 %s337_s22, 4  ;;  %s340_s6 = int_to_ptr.vmem [resolvable:$true] %s339_s6  ;;  %s342_s19 = int_to_ptr.hbm [resolvable:$true] %s341_s19 }
  0x6e   : > { %v232_v24 = vadd.s32 8, %v231_v22  ;;  %v234_v25 = vadd.s32 %v233_v23, %v231_v22  ;;  %s327_s9 = scalar_lea.sflag [#allocation5], %s893_s0  ;;  %s622_s14 = sshra.s32 %s342_s19, 4  ;;  %s623_s14 = int_to_ptr.hbm [resolvable:$true] %s622_s14 }
  0x6f   : > { %s624_s16 = scalar_lea.hbm %s623_s14, 8  ;;  %p971_p9 = scmp.ne.s32.totalorder %s966_s4, 0 }
  0x70   : > { %v235_v26 = vadd.s32 %v233_v23, %v232_v24  ;;  %vm301_vm0 = vcmp.lt.s32.totalorder %v234_v25, 61  ;;  %vm272_vm1 = vcmp.lt.s32.totalorder %v234_v25, 62  ;;  %vm242_vm2 = vcmp.lt.s32.totalorder %v234_v25, 63  ;;  %p625_p6 = scmp.ne.s32.totalorder %s623_s14, %s624_s16  ;;  %s628_s3 = scalar_lea.hbm %s951_s2, 32 }
  0x71   : > { %v303_v31 = vsel %vm301_vm0, 0.00040983607, %v707_v30  ;;  %v274_v32 = vsel %vm272_vm1, 0.0012096774, %v707_v30  ;;  %v244_v33 = vsel %vm242_vm2, 0.001984127, %v707_v30  ;;  %p629_p1 = scmp.lt.s32.totalorder %s623_s14, %s951_s2  ;;  %p630_p2 = scmp.lt.s32.totalorder %s628_s3, %s624_s16 }
  0x72   : > { %vm302_vm3 = vcmp.lt.s32.totalorder %v235_v26, 61  ;;  %vm273_vm4 = vcmp.lt.s32.totalorder %v235_v26, 62  ;;  %vm243_vm5 = vcmp.lt.s32.totalorder %v235_v26, 63  ;;  %p626_p11 = pnand %p625_p6, %p971_p9 }
  0x73   : > { %v295_v3 = vld [vmem:[#allocation2 + $0x3] sm:$0xff]  ;;  %v304_v34 = vsel %vm302_vm3, 0.00040983607, %v707_v30  ;;  %v275_v35 = vsel %vm273_vm4, 0.0012096774, %v707_v30  ;;  %p631_p0 = por %p630_p2, %p629_p1 }
  0x74   : > { %v266_v4 = vld [vmem:[#allocation2 + $0x2] sm:$0xff]  ;;  %v297_v6 = vsub.f32 %v295_v3, %v223_v0  ;;  %v296_v9 = vld [vmem:[#allocation2 + $0xb] sm:$0xff]  ;;  %v245_v38 = vsel %vm243_vm5, 0.001984127, %v707_v30  ;;  %p627_p5 = pneg %p626_p11 }
  0x75   : > { %v236_v5 = vld [vmem:[#allocation2 + $0x1] sm:$0xff]  ;;  %v268_v7 = vsub.f32 %v266_v4, %v223_v0  ;;  %v267_v10 = vld [vmem:[#allocation2 + $0xa] sm:$0xff]  ;;  %v298_v15 = vsub.f32 %v296_v9, %v224_v1 }
  0x76   : > { %v238_v8 = vsub.f32 %v236_v5, %v223_v0  ;;  %v299_v11 = vmul.f32 %v297_v6, %v297_v6  ;;  %v237_v14 = vld [vmem:[#allocation2 + $0x9] sm:$0xff]  ;;  %v269_v16 = vsub.f32 %v267_v10, %v224_v1  ;;  %p632_p8 = pnand %p631_p0, %p627_p5 }
  0x77   : > { %v270_v12 = vmul.f32 %v268_v7, %v268_v7  ;;  %v239_v17 = vsub.f32 %v237_v14, %v224_v1  ;;  %v300_v18 = vmul.f32 %v298_v15, %v298_v15 }
  0x78   : > { %v240_v13 = vmul.f32 %v238_v8, %v238_v8  ;;  %305 = vadd.xlane.f32.xlu2 %v299_v11  ;;  %v271_v19 = vmul.f32 %v269_v16, %v269_v16 }
  0x79   : > { %276 = vadd.xlane.f32.xlu1 %v270_v12  ;;  %v241_v20 = vmul.f32 %v239_v17, %v239_v17 }
  0x7a   : > { %246 = vadd.xlane.f32.xlu0 %v240_v13 }
  0x80   : > { %307 = vadd.xlane.f32.xlu2 %v300_v18 }
  0x81   : > { %278 = vadd.xlane.f32.xlu1 %v271_v19 }
  0x82   : > { %248 = vadd.xlane.f32.xlu0 %v241_v20 }
  0xeb   : > { %v306_v27 = vpop.xlane.xlu2 %305 }
  0xec   : > { %v277_v28 = vpop.xlane.xlu1 %276  ;;  %v309_v36 = vmul.f32 %v306_v27, %v303_v31 }
  0xed   : > { %v247_v29 = vpop.xlane.xlu0 %246  ;;  %v280_v37 = vmul.f32 %v277_v28, %v274_v32 }
  0xee   : > { %v250_v39 = vmul.f32 %v247_v29, %v244_v33  ;;  %v311_v46 = vsel %vm252_vm6, %v309_v36, 0.0 }
  0xef   : > { %v282_v48 = vsel %vm252_vm6, %v280_v37, 0.0 }
  0xf0   : > { %v253_v52 = vsel %vm252_vm6, %v250_v39, 0.0 }
  0xf3   : > { %v308_v40 = vpop.xlane.xlu2 %307 }
  0xf4   : > { %v279_v41 = vpop.xlane.xlu1 %278  ;;  %v310_v42 = vmul.f32 %v308_v40, %v304_v34 }
  0xf5   : > { %v281_v43 = vmul.f32 %v279_v41, %v275_v35  ;;  %v249_v44 = vpop.xlane.xlu0 %248 }
  0xf6   : > { %v251_v45 = vmul.f32 %v249_v44, %v245_v38  ;;  %v312_v47 = vsel %vm252_vm6, %v310_v42, 0.0 }
  0xf7   : > { %v283_v49 = vsel %vm252_vm6, %v281_v43, 0.0  ;;  %v313_v50 = vadd.f32 %v312_v47, %v311_v46 }
  0xf8   : > { %v284_v51 = vadd.f32 %v283_v49, %v282_v48  ;;  %v254_v53 = vsel %vm252_vm6, %v251_v45, 0.0 }
  0xf9   : > { %v255_v54 = vadd.f32 %v254_v53, %v253_v52  ;;  %314 = vadd.xlane.f32.xlu2 %v313_v50 }
  0xfa   : > { %285 = vadd.xlane.f32.xlu1 %v284_v51 }
  0xfb   : > { %256 = vadd.xlane.f32.xlu0 %v255_v54 }
 0x16c   : > { %v315_v55 = vpop.xlane.xlu2 %314 }
 0x16d   : > { %v286_v56 = vpop.xlane.xlu1 %285  ;;  %v316_v57 = vrot.slane %v315_v55, 4 }
 0x16e   : > { %v287_v58 = vrot.slane %v286_v56, 4  ;;  %v257_v59 = vpop.xlane.xlu0 %256 }
 0x16f   : > { %v258_v60 = vrot.slane %v257_v59, 4  ;;  %v317_v61 = vadd.f32 %v316_v57, %v315_v55 }
 0x170   : > { %v288_v62 = vadd.f32 %v287_v58, %v286_v56 }
 0x171   : > { %v259_v63 = vadd.f32 %v258_v60, %v257_v59  ;;  %v318_v0 = vrot.slane %v317_v61, 2 }
 0x172   : > { %v289_v1 = vrot.slane %v288_v62, 2 }
 0x173   : > { %v260_v2 = vrot.slane %v259_v63, 2  ;;  %v319_v3 = vadd.f32 %v318_v0, %v317_v61 }
 0x174   : > { %v290_v4 = vadd.f32 %v289_v1, %v288_v62 }
 0x175   : > { %v261_v5 = vadd.f32 %v260_v2, %v259_v63  ;;  %v320_v7 = vrot.slane %v319_v3, 1 }
 0x176   : > { %v291_v6 = vrot.slane %v290_v4, 1 }
 0x177   : > { %v262_v8 = vrot.slane %v261_v5, 1  ;;  %v321_v11 = vadd.f32 %v320_v7, %v319_v3 }
 0x178   : > { %v292_v9 = vadd.f32 %v291_v6, %v290_v4 }
 0x179   : > { %v263_v10 = vadd.f32 %v262_v8, %v261_v5 }
 0x17b   : > { %466 = vpush %v263_v10 }
 0x17c   : > { %468 = vpush %v292_v9 }
 0x17d   : > { %470 = vpush %v321_v11 }
 0x1ac   : > { %s467_s7 = spop %466 }
 0x1ad   : > { %s469_s21 = spop %468 }
 0x1ae   : > { %s294_s17 = sadd.f32 %s469_s21, %s467_s7  ;;  %s471_s25 = spop %470 }
 0x1b0   : > { %s323_s8 = sadd.f32 %s471_s25, %s294_s17 }
 0x1b2   : > { %v324_v12 = vstv %s323_s8 }
 0x1b3   : > { %325 = vst [vmem:[%s215_s20] sm:$0xff] %v324_v12 }
 0x1b4   : > { %635 = shalt.err (!%p632_p8)
}
 0x1b5   : > { %475 = dma.vmem_to_hbm [thread:$0]  (%p971_p9), %s340_s6, 128, %s342_s19, %s327_s9  }
 0x1b6 PF: > { %p481_p10 = scmp.ge.s32.totalorder %s702_s15, 2  ;;  %s353_s0 = sand.u32 1, %s690_s12  }
 0x1b7   : > { %p972_p12 = scmp.ne.s32.totalorder %s967_s5, 0  ;;  %s354_s30 = scalar_lea.sflag [#allocation5], %s353_s0 }
 0x1b9   : > { %p478_p13 = pnand %p481_p10, %p972_p12 }
 0x1bb   : > { %p479_p7 = pneg %p478_p13 }
 0x1bd   : > { %673 = dma.done.wait (%p479_p7), %s354_s30, 128  }
 0x1be   : > { %675 = vsyncadd (%p479_p7), %s354_s30, 4294967168  ;;  %s973_s15 = sld [smem:[#allocation13_spill]]  ;;  %s977_s9 = smov %s682_s10 }
 0x1bf   : > { %s974_s28 = sld [smem:[#allocation15_spill]]  ;;  %s978_s10 = smov %s686_s11 }
 0x1c0   : > { %s975_s26 = sld [smem:[#allocation12_spill]]  ;;  %s980_s12 = smov %s694_s13 }
 0x1c1   : > { %s976_s14 = sld [smem:[#allocation14_spill]] }
 0x1c4   : > { %p18_p4 = scmp.ge.s32.totalorder %s973_s15, 6  }
 0x1c5   : > { %s979_s11 = smov %s974_s28 }
 0x1c6   : > { %s981_s13 = smov %s975_s26  ;;  %20 = sbr.rel (!%p18_p4) target bundleno = 11 (0xb), region = 86 }
 0x1cb   :  { %360 = vsyncpa [#allocation4], 1 }
 0x1cc   :  { %362 = vsyncpa [#allocation4 + $0x1], 1 }
 0x1cd   :  { %363 = vsyncpa [#allocation7], 1 }
 0x1ce   :  { %365 = vsyncpa [#allocation7 + $0x1], 1 }
 0x1cf   :  { %366 = vsyncpa [#allocation5], 1 }
 0x1d0   :  { %368 = vsyncpa [#allocation5 + $0x1], 1 }

</bundles_post_ra>
